<compile_context>
chip_gen: v7x
topology: tpu7x:2x2x1
jax: 0.10.0
libtpu: 0.0.40
codegen_flags: <defaults>
</compile_context>

<pallas_src>
import jax
import jax.numpy as jnp
from jax import lax
from jax.experimental import pallas as pl
from jax.experimental.pallas import tpu as pltpu


# ----------------------------- Pallas kernel ------------------------------ #
def lstm_kernel(x_ref, len_ref, wih_ref, whh_ref, b_ref, h_out_ref, gx_sc):
    TB, _ = x_ref.shape
    B, H = h_out_ref.shape
    T = TB // B

    # Hoisted input projection: one MXU matmul for all timesteps at once.
    # (No sequential dependence -> off the recurrence critical path.)
    gx_sc[...] = (
        jnp.dot(x_ref[...], wih_ref[...], preferred_element_type=jnp.float32)
        + b_ref[...]
    )

    whh = whh_ref[...]                      # (H, 4H), loop-invariant (vregs)

    # Hoisted lane masks.  PyTorch gate order along 4H lanes: [i, f, g, o].
    # tanh(x) = 2*sigmoid(2x) - 1, so the g-gate lanes get scale=2, offset=-1
    # and everything else scale=1, offset=0 -> ONE sigmoid pass per step.
    lane = lax.broadcasted_iota(jnp.int32, (B, 4 * H), 1)
    g_lane = (lane >= 2 * H) & (lane < 3 * H)
    gate_scale = jnp.where(g_lane, 2.0, 1.0).astype(jnp.float32)
    gate_off = jnp.where(g_lane, -1.0, 0.0).astype(jnp.float32)

    # Hoisted length-mask broadcast: compare/select inside the loop operate on
    # already-shaped (B, H) operands (no per-iteration broadcast_in_dim).
    lens_b = jnp.broadcast_to(len_ref[...], (B, H))   # (B, H) int32

    def step(t, carry):
        h, c = carry
        base = pl.multiple_of(t * B, B)
        gates = (gx_sc[pl.ds(base, B), :]
                 + jnp.dot(h, whh, preferred_element_type=jnp.float32))
        # Single full-vreg sigmoid; g lanes recovered as tanh via scale/offset.
        s = jax.nn.sigmoid(gates * gate_scale)
        act = s * gate_scale + gate_off
        i_g = act[:, 0 * H:1 * H]
        f_g = act[:, 1 * H:2 * H]
        g_g = act[:, 2 * H:3 * H]
        o_g = act[:, 3 * H:4 * H]
        c_new = f_g * c + i_g * g_g
        h_new = o_g * jnp.tanh(c_new)
        # packed-sequence semantics: rows only update while t < length[b];
        # this also keeps zero-padded batch rows at h = c = 0.
        upd = t < lens_b
        return jnp.where(upd, h_new, h), jnp.where(upd, c_new, c)

    h0 = jnp.zeros((B, H), jnp.float32)
    c0 = jnp.zeros((B, H), jnp.float32)
    h_fin, _ = lax.fori_loop(0, T, step, (h0, c0), unroll=min(T, 8))
    h_out_ref[...] = h_fin


def lstm_pallas(x_flat, lens_col, w_ih_t, w_hh_t, bias2d):
    # x_flat   : (T*Bp, Din)  time-major, batch padded to Bp (multiple of 8)
    # lens_col : (Bp, 1) int32
    # w_ih_t   : (Din, 4H), w_hh_t : (H, 4H), bias2d : (1, 4H)
    TB = x_flat.shape[0]
    Bp = lens_col.shape[0]
    H = w_hh_t.shape[0]
    vmem = pltpu.MemorySpace.VMEM
    # TODO(synk): for large T/B/H (esp. v7x 64 MiB VMEM), chunk the hoisted
    # projection over a time-tile grid axis and stream gx tiles instead of a
    # whole-sequence scratch; unnecessary at this size.
    return pl.pallas_call(
        lstm_kernel,
        out_shape=jax.ShapeDtypeStruct((Bp, H), jnp.float32),
        in_specs=[pl.BlockSpec(memory_space=vmem)] * 5,
        out_specs=pl.BlockSpec(memory_space=vmem),
        scratch_shapes=[pltpu.VMEM((TB, 4 * H), jnp.float32)],
        compiler_params=pltpu.CompilerParams(
            vmem_limit_bytes=32 * 1024 * 1024),
    )(x_flat, lens_col, w_ih_t, w_hh_t, bias2d)


# --------------------------- Module equivalent ----------------------------- #
def init_params(key, embedding_dim, genre_embedding_dim, genre_num,
                filter_num, filter_sizes):
    input_size = filter_num * len(filter_sizes)
    d_in = input_size + genre_embedding_dim
    H = embedding_dim
    k = 1.0 / jnp.sqrt(H)
    keys = jax.random.split(key, 5)
    return {
        "genre_embedding": jax.random.normal(
            keys[0], (genre_num, genre_embedding_dim), jnp.float32),
        "w_ih": jax.random.uniform(keys[1], (4 * H, d_in), jnp.float32, -k, k),
        "w_hh": jax.random.uniform(keys[2], (4 * H, H), jnp.float32, -k, k),
        "b_ih": jax.random.uniform(keys[3], (4 * H,), jnp.float32, -k, k),
        "b_hh": jax.random.uniform(keys[4], (4 * H,), jnp.float32, -k, k),
    }


@jax.jit
def rnn_forward(params, input_titles, input_genres, lengths):
    # Glue (plain JAX): embedding lookup, descending-length sort, concat, pad.
    embedded_genres = params["genre_embedding"][input_genres]     # (B, T, G)
    perm_index = jnp.argsort(-lengths)                            # descending
    lengths_sorted = lengths[perm_index].astype(jnp.int32)
    x = jnp.concatenate([input_titles[perm_index],
                         embedded_genres[perm_index]], axis=2)    # (B, T, Din)
    B, T, Din = x.shape
    H = params["w_hh"].shape[1]

    # Pad batch to the f32 sublane tile (8); padded rows masked via length 0.
    # Single fused pad (no zeros().at[].set() round-trip).
    B_pad = max(8, ((B + 7) // 8) * 8)
    pad_rows = B_pad - B
    x_tmajor = jnp.transpose(x, (1, 0, 2)).astype(jnp.float32)    # (T, B, Din)
    x_flat = jnp.pad(
        x_tmajor, ((0, 0), (0, pad_rows), (0, 0))
    ).reshape(T * B_pad, Din)                                     # (T*Bp, Din)
    lens_pad = jnp.pad(lengths_sorted, (0, pad_rows)).reshape(B_pad, 1)

    w_ih_t = params["w_ih"].T                                     # (Din, 4H)
    w_hh_t = params["w_hh"].T                                     # (H, 4H)
    bias2d = (params["b_ih"] + params["b_hh"]).reshape(1, 4 * H)

    h_pad = lstm_pallas(x_flat, lens_pad, w_ih_t, w_hh_t, bias2d)
    return h_pad[:B], perm_index


# ------------------------------ JAX reference ------------------------------ #
def rnn_reference(params, input_titles, input_genres, lengths):
    embedded_genres = params["genre_embedding"][input_genres]
    perm_index = jnp.argsort(-lengths)
    lengths_sorted = lengths[perm_index]
    x = jnp.concatenate([input_titles[perm_index],
                         embedded_genres[perm_index]], axis=2)
    B, T, _ = x.shape
    H = params["w_hh"].shape[1]
    w_ih_t, w_hh_t = params["w_ih"].T, params["w_hh"].T
    bias = params["b_ih"] + params["b_hh"]

    def step(carry, t):
        h, c = carry
        gates = x[:, t, :] @ w_ih_t + h @ w_hh_t + bias
        i = jax.nn.sigmoid(gates[:, 0 * H:1 * H])
        f = jax.nn.sigmoid(gates[:, 1 * H:2 * H])
        g = jnp.tanh(gates[:, 2 * H:3 * H])
        o = jax.nn.sigmoid(gates[:, 3 * H:4 * H])
        c_new = f * c + i * g
        h_new = o * jnp.tanh(c_new)
        m = (t < lengths_sorted)[:, None]
        return (jnp.where(m, h_new, h), jnp.where(m, c_new, c)), None

    (h, _), _ = jax.lax.scan(step,
                             (jnp.zeros((B, H)), jnp.zeros((B, H))),
                             jnp.arange(T))
    return h, perm_index


# ----------------------------------- main ---------------------------------- #
if __name__ == "__main__":
    embedding_dim = 32          # LSTM hidden size
    genre_embedding_dim = 10
    genre_num = 5
    filter_num = 3
    filter_sizes = [3, 4]       # input_size = 6
    maximum_video_length = 8    # T

    B, T = 4, maximum_video_length
    input_size = filter_num * len(filter_sizes)

    key = jax.random.PRNGKey(0)
    k_params, k_titles, k_genres = jax.random.split(key, 3)
    params = init_params(k_params, embedding_dim, genre_embedding_dim,
                         genre_num, filter_num, filter_sizes)

    input_titles = jax.random.normal(k_titles, (B, T, input_size), jnp.float32)
    input_genres = jax.random.randint(k_genres, (B, T), 0, genre_num, jnp.int32)
    lengths = jnp.array([5, 8, 3, 6], dtype=jnp.int32)

    h_out, perm = rnn_forward(params, input_titles, input_genres, lengths)
    jax.block_until_ready((h_out, perm))

    h_ref, perm_ref = rnn_reference(params, input_titles, input_genres, lengths)
    assert jnp.array_equal(perm, perm_ref)
    assert jnp.allclose(h_out, h_ref, atol=1e-5, rtol=1e-5)

    print("KERNEL_OK")
</pallas_src>

<mosaic_0001>
module attributes {stable_mosaic.version = 11 : i64} {
  func.func @lstm_kernel(%arg0: memref<64x16xf32, #tpu.memory_space<vmem>>, %arg1: memref<8x1xi32, #tpu.memory_space<vmem>>, %arg2: memref<16x128xf32, #tpu.memory_space<vmem>>, %arg3: memref<32x128xf32, #tpu.memory_space<vmem>>, %arg4: memref<1x128xf32, #tpu.memory_space<vmem>>, %arg5: memref<8x32xf32, #tpu.memory_space<vmem>>, %arg6: memref<64x128xf32, #tpu.memory_space<vmem>>) attributes {dimension_semantics = [], scalar_prefetch = 0 : i64, scratch_operands = 1 : i64, tpu.core_type = #tpu.core_type<tc>} {
    %c0 = arith.constant 0 : index
    %c0_0 = arith.constant 0 : index
    %0 = vector.load %arg0[%c0, %c0_0] : memref<64x16xf32, #tpu.memory_space<vmem>>, vector<64x16xf32>
    %c0_1 = arith.constant 0 : index
    %c0_2 = arith.constant 0 : index
    %1 = vector.load %arg2[%c0_1, %c0_2] : memref<16x128xf32, #tpu.memory_space<vmem>>, vector<16x128xf32>
    %cst = arith.constant dense<0.000000e+00> : vector<64x128xf32>
    %2 = tpu.matmul %0, %1, %cst {dimension_numbers = #tpu.dot_dimension_numbers<[1], [0], [0], [1], [0, 0, 1, 1], [], []>} : vector<64x16xf32>, vector<16x128xf32>, vector<64x128xf32> -> vector<64x128xf32>
    %c0_3 = arith.constant 0 : index
    %c0_4 = arith.constant 0 : index
    %3 = vector.load %arg4[%c0_3, %c0_4] : memref<1x128xf32, #tpu.memory_space<vmem>>, vector<1x128xf32>
    %4 = vector.broadcast %3 : vector<1x128xf32> to vector<64x128xf32>
    %5 = arith.addf %2, %4 : vector<64x128xf32>
    %c0_5 = arith.constant 0 : index
    %c0_6 = arith.constant 0 : index
    %6 = vector.load %arg6[%c0_5, %c0_6] : memref<64x128xf32, #tpu.memory_space<vmem>>, vector<64x128xf32>
    tpu.vector_store %arg6[%c0_5, %c0_6], %5 {strides = array<i32>} : memref<64x128xf32, #tpu.memory_space<vmem>>, vector<64x128xf32>,
    %c0_7 = arith.constant 0 : index
    %c0_8 = arith.constant 0 : index
    %7 = vector.load %arg3[%c0_7, %c0_8] : memref<32x128xf32, #tpu.memory_space<vmem>>, vector<32x128xf32>
    %8 = tpu.iota {dimensions = array<i32: 1>} : vector<8x128xi32>
    %c64_i32 = arith.constant 64 : i32
    %9 = vector.broadcast %c64_i32 : i32 to vector<8x128xi32>
    %10 = arith.cmpi sge, %8, %9 : vector<8x128xi32>
    %c96_i32 = arith.constant 96 : i32
    %11 = vector.broadcast %c96_i32 : i32 to vector<8x128xi32>
    %12 = arith.cmpi slt, %8, %11 : vector<8x128xi32>
    %13 = arith.andi %10, %12 : vector<8x128xi1>
    %cst_9 = arith.constant 2.000000e+00 : f32
    %cst_10 = arith.constant 1.000000e+00 : f32
    %14 = vector.broadcast %cst_9 : f32 to vector<8x128xf32>
    %15 = vector.broadcast %cst_10 : f32 to vector<8x128xf32>
    %16 = arith.select %13, %14, %15 : vector<8x128xi1>, vector<8x128xf32>
    %cst_11 = arith.constant -1.000000e+00 : f32
    %cst_12 = arith.constant 0.000000e+00 : f32
    %17 = vector.broadcast %cst_11 : f32 to vector<8x128xf32>
    %18 = vector.broadcast %cst_12 : f32 to vector<8x128xf32>
    %19 = arith.select %13, %17, %18 : vector<8x128xi1>, vector<8x128xf32>
    %c0_13 = arith.constant 0 : index
    %c0_14 = arith.constant 0 : index
    %20 = vector.load %arg1[%c0_13, %c0_14] : memref<8x1xi32, #tpu.memory_space<vmem>>, vector<8x1xi32>
    %21 = vector.shape_cast %20 : vector<8x1xi32> to vector<8x1xi32>
    %22 = vector.broadcast %21 : vector<8x1xi32> to vector<8x32xi32>
    %cst_15 = arith.constant 0.000000e+00 : f32
    %23 = vector.broadcast %cst_15 : f32 to vector<8x32xf32>
    %cst_16 = arith.constant 0.000000e+00 : f32
    %24 = vector.broadcast %cst_16 : f32 to vector<8x32xf32>
    %c0_i32 = arith.constant 0 : i32
    %c8_i32 = arith.constant 8 : i32
    %25 = arith.muli %c0_i32, %c8_i32 : i32
    %26 = tpu.assume_multiple %25, 8 : i32
    %27 = arith.index_cast %26 : i32 to index
    %c0_17 = arith.constant 0 : index
    %28 = vector.load %arg6[%27, %c0_17] : memref<64x128xf32, #tpu.memory_space<vmem>>, vector<8x128xf32>
    %cst_18 = arith.constant dense<0.000000e+00> : vector<8x128xf32>
    %29 = tpu.matmul %23, %7, %cst_18 {dimension_numbers = #tpu.dot_dimension_numbers<[1], [0], [0], [1], [0, 0, 1, 1], [], []>} : vector<8x32xf32>, vector<32x128xf32>, vector<8x128xf32> -> vector<8x128xf32>
    %30 = arith.addf %28, %29 : vector<8x128xf32>
    %31 = arith.mulf %30, %16 : vector<8x128xf32>
    %32 = arith.negf %31 : vector<8x128xf32>
    %33 = math.exp %32 : vector<8x128xf32>
    %cst_19 = arith.constant 1.000000e+00 : f32
    %34 = vector.broadcast %cst_19 : f32 to vector<8x128xf32>
    %35 = arith.addf %34, %33 : vector<8x128xf32>
    %36 = arith.divf %34, %35 : vector<8x128xf32>
    %37 = arith.mulf %36, %16 : vector<8x128xf32>
    %38 = arith.addf %37, %19 : vector<8x128xf32>
    %39 = vector.extract_strided_slice %38 {offsets = [0, 0], sizes = [8, 32], strides = [1, 1]} : vector<8x128xf32> to vector<8x32xf32>
    %40 = vector.extract_strided_slice %38 {offsets = [0, 32], sizes = [8, 32], strides = [1, 1]} : vector<8x128xf32> to vector<8x32xf32>
    %41 = vector.extract_strided_slice %38 {offsets = [0, 64], sizes = [8, 32], strides = [1, 1]} : vector<8x128xf32> to vector<8x32xf32>
    %42 = vector.extract_strided_slice %38 {offsets = [0, 96], sizes = [8, 32], strides = [1, 1]} : vector<8x128xf32> to vector<8x32xf32>
    %43 = arith.mulf %40, %24 : vector<8x32xf32>
    %44 = arith.mulf %39, %41 : vector<8x32xf32>
    %45 = arith.addf %43, %44 : vector<8x32xf32>
    %46 = math.tanh %45 : vector<8x32xf32>
    %47 = arith.mulf %42, %46 : vector<8x32xf32>
    %48 = vector.broadcast %c0_i32 : i32 to vector<8x32xi32>
    %49 = arith.cmpi slt, %48, %22 : vector<8x32xi32>
    %50 = arith.select %49, %47, %23 : vector<8x32xi1>, vector<8x32xf32>
    %51 = arith.select %49, %45, %24 : vector<8x32xi1>, vector<8x32xf32>
    %c1_i32 = arith.constant 1 : i32
    %c8_i32_20 = arith.constant 8 : i32
    %52 = arith.muli %c1_i32, %c8_i32_20 : i32
    %53 = tpu.assume_multiple %52, 8 : i32
    %54 = arith.index_cast %53 : i32 to index
    %c0_21 = arith.constant 0 : index
    %55 = vector.load %arg6[%54, %c0_21] : memref<64x128xf32, #tpu.memory_space<vmem>>, vector<8x128xf32>
    %cst_22 = arith.constant dense<0.000000e+00> : vector<8x128xf32>
    %56 = tpu.matmul %50, %7, %cst_22 {dimension_numbers = #tpu.dot_dimension_numbers<[1], [0], [0], [1], [0, 0, 1, 1], [], []>} : vector<8x32xf32>, vector<32x128xf32>, vector<8x128xf32> -> vector<8x128xf32>
    %57 = arith.addf %55, %56 : vector<8x128xf32>
    %58 = arith.mulf %57, %16 : vector<8x128xf32>
    %59 = arith.negf %58 : vector<8x128xf32>
    %60 = math.exp %59 : vector<8x128xf32>
    %cst_23 = arith.constant 1.000000e+00 : f32
    %61 = vector.broadcast %cst_23 : f32 to vector<8x128xf32>
    %62 = arith.addf %61, %60 : vector<8x128xf32>
    %63 = arith.divf %61, %62 : vector<8x128xf32>
    %64 = arith.mulf %63, %16 : vector<8x128xf32>
    %65 = arith.addf %64, %19 : vector<8x128xf32>
    %66 = vector.extract_strided_slice %65 {offsets = [0, 0], sizes = [8, 32], strides = [1, 1]} : vector<8x128xf32> to vector<8x32xf32>
    %67 = vector.extract_strided_slice %65 {offsets = [0, 32], sizes = [8, 32], strides = [1, 1]} : vector<8x128xf32> to vector<8x32xf32>
    %68 = vector.extract_strided_slice %65 {offsets = [0, 64], sizes = [8, 32], strides = [1, 1]} : vector<8x128xf32> to vector<8x32xf32>
    %69 = vector.extract_strided_slice %65 {offsets = [0, 96], sizes = [8, 32], strides = [1, 1]} : vector<8x128xf32> to vector<8x32xf32>
    %70 = arith.mulf %67, %51 : vector<8x32xf32>
    %71 = arith.mulf %66, %68 : vector<8x32xf32>
    %72 = arith.addf %70, %71 : vector<8x32xf32>
    %73 = math.tanh %72 : vector<8x32xf32>
    %74 = arith.mulf %69, %73 : vector<8x32xf32>
    %75 = vector.broadcast %c1_i32 : i32 to vector<8x32xi32>
    %76 = arith.cmpi slt, %75, %22 : vector<8x32xi32>
    %77 = arith.select %76, %74, %50 : vector<8x32xi1>, vector<8x32xf32>
    %78 = arith.select %76, %72, %51 : vector<8x32xi1>, vector<8x32xf32>
    %c2_i32 = arith.constant 2 : i32
    %c8_i32_24 = arith.constant 8 : i32
    %79 = arith.muli %c2_i32, %c8_i32_24 : i32
    %80 = tpu.assume_multiple %79, 8 : i32
    %81 = arith.index_cast %80 : i32 to index
    %c0_25 = arith.constant 0 : index
    %82 = vector.load %arg6[%81, %c0_25] : memref<64x128xf32, #tpu.memory_space<vmem>>, vector<8x128xf32>
    %cst_26 = arith.constant dense<0.000000e+00> : vector<8x128xf32>
    %83 = tpu.matmul %77, %7, %cst_26 {dimension_numbers = #tpu.dot_dimension_numbers<[1], [0], [0], [1], [0, 0, 1, 1], [], []>} : vector<8x32xf32>, vector<32x128xf32>, vector<8x128xf32> -> vector<8x128xf32>
    %84 = arith.addf %82, %83 : vector<8x128xf32>
    %85 = arith.mulf %84, %16 : vector<8x128xf32>
    %86 = arith.negf %85 : vector<8x128xf32>
    %87 = math.exp %86 : vector<8x128xf32>
    %cst_27 = arith.constant 1.000000e+00 : f32
    %88 = vector.broadcast %cst_27 : f32 to vector<8x128xf32>
    %89 = arith.addf %88, %87 : vector<8x128xf32>
    %90 = arith.divf %88, %89 : vector<8x128xf32>
    %91 = arith.mulf %90, %16 : vector<8x128xf32>
    %92 = arith.addf %91, %19 : vector<8x128xf32>
    %93 = vector.extract_strided_slice %92 {offsets = [0, 0], sizes = [8, 32], strides = [1, 1]} : vector<8x128xf32> to vector<8x32xf32>
    %94 = vector.extract_strided_slice %92 {offsets = [0, 32], sizes = [8, 32], strides = [1, 1]} : vector<8x128xf32> to vector<8x32xf32>
    %95 = vector.extract_strided_slice %92 {offsets = [0, 64], sizes = [8, 32], strides = [1, 1]} : vector<8x128xf32> to vector<8x32xf32>
    %96 = vector.extract_strided_slice %92 {offsets = [0, 96], sizes = [8, 32], strides = [1, 1]} : vector<8x128xf32> to vector<8x32xf32>
    %97 = arith.mulf %94, %78 : vector<8x32xf32>
    %98 = arith.mulf %93, %95 : vector<8x32xf32>
    %99 = arith.addf %97, %98 : vector<8x32xf32>
    %100 = math.tanh %99 : vector<8x32xf32>
    %101 = arith.mulf %96, %100 : vector<8x32xf32>
    %102 = vector.broadcast %c2_i32 : i32 to vector<8x32xi32>
    %103 = arith.cmpi slt, %102, %22 : vector<8x32xi32>
    %104 = arith.select %103, %101, %77 : vector<8x32xi1>, vector<8x32xf32>
    %105 = arith.select %103, %99, %78 : vector<8x32xi1>, vector<8x32xf32>
    %c3_i32 = arith.constant 3 : i32
    %c8_i32_28 = arith.constant 8 : i32
    %106 = arith.muli %c3_i32, %c8_i32_28 : i32
    %107 = tpu.assume_multiple %106, 8 : i32
    %108 = arith.index_cast %107 : i32 to index
    %c0_29 = arith.constant 0 : index
    %109 = vector.load %arg6[%108, %c0_29] : memref<64x128xf32, #tpu.memory_space<vmem>>, vector<8x128xf32>
    %cst_30 = arith.constant dense<0.000000e+00> : vector<8x128xf32>
    %110 = tpu.matmul %104, %7, %cst_30 {dimension_numbers = #tpu.dot_dimension_numbers<[1], [0], [0], [1], [0, 0, 1, 1], [], []>} : vector<8x32xf32>, vector<32x128xf32>, vector<8x128xf32> -> vector<8x128xf32>
    %111 = arith.addf %109, %110 : vector<8x128xf32>
    %112 = arith.mulf %111, %16 : vector<8x128xf32>
    %113 = arith.negf %112 : vector<8x128xf32>
    %114 = math.exp %113 : vector<8x128xf32>
    %cst_31 = arith.constant 1.000000e+00 : f32
    %115 = vector.broadcast %cst_31 : f32 to vector<8x128xf32>
    %116 = arith.addf %115, %114 : vector<8x128xf32>
    %117 = arith.divf %115, %116 : vector<8x128xf32>
    %118 = arith.mulf %117, %16 : vector<8x128xf32>
    %119 = arith.addf %118, %19 : vector<8x128xf32>
    %120 = vector.extract_strided_slice %119 {offsets = [0, 0], sizes = [8, 32], strides = [1, 1]} : vector<8x128xf32> to vector<8x32xf32>
    %121 = vector.extract_strided_slice %119 {offsets = [0, 32], sizes = [8, 32], strides = [1, 1]} : vector<8x128xf32> to vector<8x32xf32>
    %122 = vector.extract_strided_slice %119 {offsets = [0, 64], sizes = [8, 32], strides = [1, 1]} : vector<8x128xf32> to vector<8x32xf32>
    %123 = vector.extract_strided_slice %119 {offsets = [0, 96], sizes = [8, 32], strides = [1, 1]} : vector<8x128xf32> to vector<8x32xf32>
    %124 = arith.mulf %121, %105 : vector<8x32xf32>
    %125 = arith.mulf %120, %122 : vector<8x32xf32>
    %126 = arith.addf %124, %125 : vector<8x32xf32>
    %127 = math.tanh %126 : vector<8x32xf32>
    %128 = arith.mulf %123, %127 : vector<8x32xf32>
    %129 = vector.broadcast %c3_i32 : i32 to vector<8x32xi32>
    %130 = arith.cmpi slt, %129, %22 : vector<8x32xi32>
    %131 = arith.select %130, %128, %104 : vector<8x32xi1>, vector<8x32xf32>
    %132 = arith.select %130, %126, %105 : vector<8x32xi1>, vector<8x32xf32>
    %c4_i32 = arith.constant 4 : i32
    %c8_i32_32 = arith.constant 8 : i32
    %133 = arith.muli %c4_i32, %c8_i32_32 : i32
    %134 = tpu.assume_multiple %133, 8 : i32
    %135 = arith.index_cast %134 : i32 to index
    %c0_33 = arith.constant 0 : index
    %136 = vector.load %arg6[%135, %c0_33] : memref<64x128xf32, #tpu.memory_space<vmem>>, vector<8x128xf32>
    %cst_34 = arith.constant dense<0.000000e+00> : vector<8x128xf32>
    %137 = tpu.matmul %131, %7, %cst_34 {dimension_numbers = #tpu.dot_dimension_numbers<[1], [0], [0], [1], [0, 0, 1, 1], [], []>} : vector<8x32xf32>, vector<32x128xf32>, vector<8x128xf32> -> vector<8x128xf32>
    %138 = arith.addf %136, %137 : vector<8x128xf32>
    %139 = arith.mulf %138, %16 : vector<8x128xf32>
    %140 = arith.negf %139 : vector<8x128xf32>
    %141 = math.exp %140 : vector<8x128xf32>
    %cst_35 = arith.constant 1.000000e+00 : f32
    %142 = vector.broadcast %cst_35 : f32 to vector<8x128xf32>
    %143 = arith.addf %142, %141 : vector<8x128xf32>
    %144 = arith.divf %142, %143 : vector<8x128xf32>
    %145 = arith.mulf %144, %16 : vector<8x128xf32>
    %146 = arith.addf %145, %19 : vector<8x128xf32>
    %147 = vector.extract_strided_slice %146 {offsets = [0, 0], sizes = [8, 32], strides = [1, 1]} : vector<8x128xf32> to vector<8x32xf32>
    %148 = vector.extract_strided_slice %146 {offsets = [0, 32], sizes = [8, 32], strides = [1, 1]} : vector<8x128xf32> to vector<8x32xf32>
    %149 = vector.extract_strided_slice %146 {offsets = [0, 64], sizes = [8, 32], strides = [1, 1]} : vector<8x128xf32> to vector<8x32xf32>
    %150 = vector.extract_strided_slice %146 {offsets = [0, 96], sizes = [8, 32], strides = [1, 1]} : vector<8x128xf32> to vector<8x32xf32>
    %151 = arith.mulf %148, %132 : vector<8x32xf32>
    %152 = arith.mulf %147, %149 : vector<8x32xf32>
    %153 = arith.addf %151, %152 : vector<8x32xf32>
    %154 = math.tanh %153 : vector<8x32xf32>
    %155 = arith.mulf %150, %154 : vector<8x32xf32>
    %156 = vector.broadcast %c4_i32 : i32 to vector<8x32xi32>
    %157 = arith.cmpi slt, %156, %22 : vector<8x32xi32>
    %158 = arith.select %157, %155, %131 : vector<8x32xi1>, vector<8x32xf32>
    %159 = arith.select %157, %153, %132 : vector<8x32xi1>, vector<8x32xf32>
    %c5_i32 = arith.constant 5 : i32
    %c8_i32_36 = arith.constant 8 : i32
    %160 = arith.muli %c5_i32, %c8_i32_36 : i32
    %161 = tpu.assume_multiple %160, 8 : i32
    %162 = arith.index_cast %161 : i32 to index
    %c0_37 = arith.constant 0 : index
    %163 = vector.load %arg6[%162, %c0_37] : memref<64x128xf32, #tpu.memory_space<vmem>>, vector<8x128xf32>
    %cst_38 = arith.constant dense<0.000000e+00> : vector<8x128xf32>
    %164 = tpu.matmul %158, %7, %cst_38 {dimension_numbers = #tpu.dot_dimension_numbers<[1], [0], [0], [1], [0, 0, 1, 1], [], []>} : vector<8x32xf32>, vector<32x128xf32>, vector<8x128xf32> -> vector<8x128xf32>
    %165 = arith.addf %163, %164 : vector<8x128xf32>
    %166 = arith.mulf %165, %16 : vector<8x128xf32>
    %167 = arith.negf %166 : vector<8x128xf32>
    %168 = math.exp %167 : vector<8x128xf32>
    %cst_39 = arith.constant 1.000000e+00 : f32
    %169 = vector.broadcast %cst_39 : f32 to vector<8x128xf32>
    %170 = arith.addf %169, %168 : vector<8x128xf32>
    %171 = arith.divf %169, %170 : vector<8x128xf32>
    %172 = arith.mulf %171, %16 : vector<8x128xf32>
    %173 = arith.addf %172, %19 : vector<8x128xf32>
    %174 = vector.extract_strided_slice %173 {offsets = [0, 0], sizes = [8, 32], strides = [1, 1]} : vector<8x128xf32> to vector<8x32xf32>
    %175 = vector.extract_strided_slice %173 {offsets = [0, 32], sizes = [8, 32], strides = [1, 1]} : vector<8x128xf32> to vector<8x32xf32>
    %176 = vector.extract_strided_slice %173 {offsets = [0, 64], sizes = [8, 32], strides = [1, 1]} : vector<8x128xf32> to vector<8x32xf32>
    %177 = vector.extract_strided_slice %173 {offsets = [0, 96], sizes = [8, 32], strides = [1, 1]} : vector<8x128xf32> to vector<8x32xf32>
    %178 = arith.mulf %175, %159 : vector<8x32xf32>
    %179 = arith.mulf %174, %176 : vector<8x32xf32>
    %180 = arith.addf %178, %179 : vector<8x32xf32>
    %181 = math.tanh %180 : vector<8x32xf32>
    %182 = arith.mulf %177, %181 : vector<8x32xf32>
    %183 = vector.broadcast %c5_i32 : i32 to vector<8x32xi32>
    %184 = arith.cmpi slt, %183, %22 : vector<8x32xi32>
    %185 = arith.select %184, %182, %158 : vector<8x32xi1>, vector<8x32xf32>
    %186 = arith.select %184, %180, %159 : vector<8x32xi1>, vector<8x32xf32>
    %c6_i32 = arith.constant 6 : i32
    %c8_i32_40 = arith.constant 8 : i32
    %187 = arith.muli %c6_i32, %c8_i32_40 : i32
    %188 = tpu.assume_multiple %187, 8 : i32
    %189 = arith.index_cast %188 : i32 to index
    %c0_41 = arith.constant 0 : index
    %190 = vector.load %arg6[%189, %c0_41] : memref<64x128xf32, #tpu.memory_space<vmem>>, vector<8x128xf32>
    %cst_42 = arith.constant dense<0.000000e+00> : vector<8x128xf32>
    %191 = tpu.matmul %185, %7, %cst_42 {dimension_numbers = #tpu.dot_dimension_numbers<[1], [0], [0], [1], [0, 0, 1, 1], [], []>} : vector<8x32xf32>, vector<32x128xf32>, vector<8x128xf32> -> vector<8x128xf32>
    %192 = arith.addf %190, %191 : vector<8x128xf32>
    %193 = arith.mulf %192, %16 : vector<8x128xf32>
    %194 = arith.negf %193 : vector<8x128xf32>
    %195 = math.exp %194 : vector<8x128xf32>
    %cst_43 = arith.constant 1.000000e+00 : f32
    %196 = vector.broadcast %cst_43 : f32 to vector<8x128xf32>
    %197 = arith.addf %196, %195 : vector<8x128xf32>
    %198 = arith.divf %196, %197 : vector<8x128xf32>
    %199 = arith.mulf %198, %16 : vector<8x128xf32>
    %200 = arith.addf %199, %19 : vector<8x128xf32>
    %201 = vector.extract_strided_slice %200 {offsets = [0, 0], sizes = [8, 32], strides = [1, 1]} : vector<8x128xf32> to vector<8x32xf32>
    %202 = vector.extract_strided_slice %200 {offsets = [0, 32], sizes = [8, 32], strides = [1, 1]} : vector<8x128xf32> to vector<8x32xf32>
    %203 = vector.extract_strided_slice %200 {offsets = [0, 64], sizes = [8, 32], strides = [1, 1]} : vector<8x128xf32> to vector<8x32xf32>
    %204 = vector.extract_strided_slice %200 {offsets = [0, 96], sizes = [8, 32], strides = [1, 1]} : vector<8x128xf32> to vector<8x32xf32>
    %205 = arith.mulf %202, %186 : vector<8x32xf32>
    %206 = arith.mulf %201, %203 : vector<8x32xf32>
    %207 = arith.addf %205, %206 : vector<8x32xf32>
    %208 = math.tanh %207 : vector<8x32xf32>
    %209 = arith.mulf %204, %208 : vector<8x32xf32>
    %210 = vector.broadcast %c6_i32 : i32 to vector<8x32xi32>
    %211 = arith.cmpi slt, %210, %22 : vector<8x32xi32>
    %212 = arith.select %211, %209, %185 : vector<8x32xi1>, vector<8x32xf32>
    %213 = arith.select %211, %207, %186 : vector<8x32xi1>, vector<8x32xf32>
    %c7_i32 = arith.constant 7 : i32
    %c8_i32_44 = arith.constant 8 : i32
    %214 = arith.muli %c7_i32, %c8_i32_44 : i32
    %215 = tpu.assume_multiple %214, 8 : i32
    %216 = arith.index_cast %215 : i32 to index
    %c0_45 = arith.constant 0 : index
    %217 = vector.load %arg6[%216, %c0_45] : memref<64x128xf32, #tpu.memory_space<vmem>>, vector<8x128xf32>
    %cst_46 = arith.constant dense<0.000000e+00> : vector<8x128xf32>
    %218 = tpu.matmul %212, %7, %cst_46 {dimension_numbers = #tpu.dot_dimension_numbers<[1], [0], [0], [1], [0, 0, 1, 1], [], []>} : vector<8x32xf32>, vector<32x128xf32>, vector<8x128xf32> -> vector<8x128xf32>
    %219 = arith.addf %217, %218 : vector<8x128xf32>
    %220 = arith.mulf %219, %16 : vector<8x128xf32>
    %221 = arith.negf %220 : vector<8x128xf32>
    %222 = math.exp %221 : vector<8x128xf32>
    %cst_47 = arith.constant 1.000000e+00 : f32
    %223 = vector.broadcast %cst_47 : f32 to vector<8x128xf32>
    %224 = arith.addf %223, %222 : vector<8x128xf32>
    %225 = arith.divf %223, %224 : vector<8x128xf32>
    %226 = arith.mulf %225, %16 : vector<8x128xf32>
    %227 = arith.addf %226, %19 : vector<8x128xf32>
    %228 = vector.extract_strided_slice %227 {offsets = [0, 0], sizes = [8, 32], strides = [1, 1]} : vector<8x128xf32> to vector<8x32xf32>
    %229 = vector.extract_strided_slice %227 {offsets = [0, 32], sizes = [8, 32], strides = [1, 1]} : vector<8x128xf32> to vector<8x32xf32>
    %230 = vector.extract_strided_slice %227 {offsets = [0, 64], sizes = [8, 32], strides = [1, 1]} : vector<8x128xf32> to vector<8x32xf32>
    %231 = vector.extract_strided_slice %227 {offsets = [0, 96], sizes = [8, 32], strides = [1, 1]} : vector<8x128xf32> to vector<8x32xf32>
    %232 = arith.mulf %229, %213 : vector<8x32xf32>
    %233 = arith.mulf %228, %230 : vector<8x32xf32>
    %234 = arith.addf %232, %233 : vector<8x32xf32>
    %235 = math.tanh %234 : vector<8x32xf32>
    %236 = arith.mulf %231, %235 : vector<8x32xf32>
    %237 = vector.broadcast %c7_i32 : i32 to vector<8x32xi32>
    %238 = arith.cmpi slt, %237, %22 : vector<8x32xi32>
    %239 = arith.select %238, %236, %212 : vector<8x32xi1>, vector<8x32xf32>
    %240 = arith.select %238, %234, %213 : vector<8x32xi1>, vector<8x32xf32>
    %c8_i32_48 = arith.constant 8 : i32
    %c0_49 = arith.constant 0 : index
    %c0_50 = arith.constant 0 : index
    %241 = vector.load %arg5[%c0_49, %c0_50] : memref<8x32xf32, #tpu.memory_space<vmem>>, vector<8x32xf32>
    tpu.vector_store %arg5[%c0_49, %c0_50], %239 {strides = array<i32>} : memref<8x32xf32, #tpu.memory_space<vmem>>, vector<8x32xf32>,
    return
  }
}

</mosaic_0001>

<bundles_post_ra>
// kernel: neg.1
= control target key start
LH: loop header
LB: loop body
LE: loop exit
PB: predicated region body
PF: predicated region fallthrough
CT: control target
= control target key end

     0   :  { %s24_s0 = inlined_call_operand.vmem [shape: s32[4], index: 0, kind: input, shape index: {}]   ;;  %s25_s1 = inlined_call_operand.vmem [shape: s32[4], index: 1, kind: output, shape index: {}]  }
   0x1   :  { %v2_v0 = vld [vmem:[%s24_s0] sm:$0x1] }
   0x2   :  { %v5_v1 = vsub.s32 0, %v2_v0 }
   0x4   :  { %7 = vst [vmem:[%s25_s1] sm:$0x1] %v5_v1 }

// kernel: rnn_forward.1
= control target key start
LH: loop header
LB: loop body
LE: loop exit
PB: predicated region body
PF: predicated region fallthrough
CT: control target
= control target key end

     0   :  { %vm37_vm0 = vcmask 130048   ;;  %v1339_v0 = vmov 0.0|0.0   ;;  %vm1340_vm1 = vmmov 0   ;;  %v1341_v4 = vmov 0.0   ;;  %s1617_s2 = inlined_call_operand.vmem [shape: f32[16,128], index: 2, kind: input, shape index: {}]   ;;  %s1618_s3 = inlined_call_operand.vmem [shape: f32[32,128], index: 3, kind: input, shape index: {}]   ;;  %s1619_s0 = inlined_call_operand.vmem [shape: f32[64,16], index: 0, kind: input, shape index: {}]   ;;  %s1620_s1 = inlined_call_operand.vmem [shape: s32[8,1], index: 1, kind: input, shape index: {}]   ;;  %s1621_s4 = inlined_call_operand.vmem [shape: f32[1,128], index: 4, kind: input, shape index: {}]   ;;  %s1622_s5 = inlined_call_operand.vmem [shape: f32[8,32], index: 5, kind: output, shape index: {}]  }
   0x1   :  { %1234 = vmatprep.subr.bf16.mxu1 %v1339_v0  ;;  %v28_v1 = vld [vmem:[%s1617_s2] sm:$0xff]  ;;  %v29_v2 = vld [vmem:[%s1617_s2 + $0x8] sm:$0xff]  ;;  %1150 = vmatprep.mubr.msk.f32.mxu1 %vm1340_vm1, %v1341_v4  ;;  %v177_v9 = vld [vmem:[%s1618_s3 + $0x10] sm:$0xff]  ;;  %v1342_v13 = vmov 0   ;;  %v179_v15 = vlaneseq  ;;  %v1343_v21 = vmov 1.0   ;;  %vm191_vm6 = vcmask 261120  }
   0x2   :  { %v175_v3 = vld [vmem:[%s1618_s3] sm:$0xff]  ;;  %v1230_v5 = vpack.c.bf16 %v29_v2, %v28_v1  ;;  %v176_v6 = vld [vmem:[%s1618_s3 + $0x8] sm:$0xff]  ;;  %v178_v10 = vld [vmem:[%s1618_s3 + $0x18] sm:$0xff]  ;;  %1289 = vset.pattern.permute.xlu1 %v1342_v13  ;;  %1290 = vset.pattern.permute.xlu0 %v1342_v13 }
   0x3   :  { %v20_v7 = vld [vmem:[%s1619_s0] sm:$0xff]  ;;  %v1394_v8 = vpack.c.bf16 %v176_v6, %v175_v3  ;;  %v21_v11 = vld [vmem:[%s1619_s0 + $0x8] sm:$0xff]  ;;  %v1407_v12 = vpack.c.bf16 %v178_v10, %v177_v9  ;;  %v180_v16 = vand.u32 127, %v179_v15  ;;  %v22_v62 = vld [vmem:[%s1619_s0 + $0x10] sm:$0xff] }
   0x4   :  { %1130 = vmatprep.mubr.msk.f32.mxu0 %vm37_vm0, %v20_v7  ;;  %1231 = vmatprep.subr.bf16.mxu0 %v1230_v5  ;;  %v186_v14 = vld [vmem:[%s1620_s1] sm:$0xff]  ;;  %s1344_s1 = smov 64   ;;  %v23_v63 = vld [vmem:[%s1619_s0 + $0x18] sm:$0xff]  ;;  %v25_v2 = vld [vmem:[%s1619_s0 + $0x28] sm:$0xff] }
   0x5   :  { %1236 = vmatpush3.bf16.msra.mxu1 %v1394_v8  ;;  %1233 = vmatpush3.bf16.msra.mxu0 %v1230_v5  ;;  %vm181_vm2 = vcmp.ge.s32.totalorder %v180_v16, 64  ;;  %vm182_vm3 = vcmp.lt.s32.totalorder %v180_v16, 96  ;;  %v1431_v17 = vld [vmem:[%s1621_s4] ss:$0 sm:$0xff]  ;;  %s1345_s4 = smov 32   ;;  %v26_v3 = vld [vmem:[%s1619_s0 + $0x30] sm:$0xff] }
   0x6   :  { %1237 = vmatprep.subr.bf16.mxu1 %v1339_v0  ;;  %1246 = vmatprep.subr.bf16.mxu0 %v1339_v0  ;;  %vm183_vm4 = vmand %vm181_vm2, %vm182_vm3  ;;  %v24_v1 = vld [vmem:[%s1619_s0 + $0x20] sm:$0xff]  ;;  %v27_v5 = vld [vmem:[%s1619_s0 + $0x38] sm:$0xff] }
   0x7   :  { %188 = vperm.xlu1 %1289, %v186_v14   ;;  %v1434_v22 = vsel %vm183_vm4, 2.0, %v1343_v21  ;;  %v1438_v31 = vsel %vm183_vm4, -1.0, %v1341_v4 }
   0x8   :  { %1131 = vmatmul.mubr.msk.f32.vlgmr.msra.gmra.mrb[0].mxu0 %vm37_vm0, %v21_v11 }
   0x9   :  { %1239 = vmatpush3.bf16.msra.mxu1 %v1407_v12  ;;  %1248 = vmatpush3.bf16.msra.mxu0 %v1394_v8 }
   0xa   :  { %1240 = vmatprep.subr.bf16.mxu1 %v1339_v0  ;;  %1249 = vmatprep.subr.bf16.mxu0 %v1339_v0 }
   0xb   :  { %1133 = vmatprep.mubr.msk.f32.mxu0 %vm37_vm0, %v22_v62 }
   0xc   :  { %1151 = vmatmul.mubr.f32.vlgmr.msra.gmra.mrb[0].mxu1 %v1341_v4  ;;  %1134 = vmatmul.mubr.msk.f32.gmra.mrb[2].mxu0 %vm37_vm0, %v23_v63 }
   0xd   :  { %1242 = vmatpush3.bf16.msra.mxu1 %v1394_v8  ;;  %1161 = vmatprep.mubr.msk.f32.mxu1 %vm1340_vm1, %v1341_v4 }
   0xe   :  { %1243 = vmatprep.subr.bf16.mxu1 %v1339_v0  ;;  %1251 = vmatpush3.bf16.msra.mxu0 %v1407_v12 }
   0xf   :  { %1258 = vmatprep.subr.bf16.mxu0 %v1339_v0  ;;  %1136 = vmatprep.mubr.msk.f32.mxu0 %vm37_vm0, %v24_v1 }
  0x10   :  { %1137 = vmatmul.mubr.msk.f32.gmra.mrb[4].mxu0 %vm37_vm0, %v25_v2 }
  0x11   :  { %1245 = vmatpush3.bf16.msra.mxu1 %v1407_v12  ;;  %1139 = vmatprep.mubr.msk.f32.mxu0 %vm37_vm0, %v26_v3 }
  0x12   :  { %1252 = vmatprep.subr.bf16.mxu1 %v1339_v0 }
  0x14   :  { %1140 = vmatmul.mubr.msk.f32.gmra.mrb[6].mxu0 %vm37_vm0, %v27_v5 }
  0x15   :  { %1172 = vmatprep.mubr.msk.f32.mxu0 %vm1340_vm1, %v1341_v4 }
  0x86   :  { %v1445_v40 = vpop.permute.xlu1 %188 }
  0x87   :  { %vm292_vm5 = vcmp.gt.s32.totalorder %v1445_v40, 0  ;;  %vm399_vm7 = vcmp.gt.s32.totalorder %v1445_v40, 1  ;;  %vm506_vm8 = vcmp.gt.s32.totalorder %v1445_v40, 2  ;;  %vm613_vm9 = vcmp.gt.s32.totalorder %v1445_v40, 3 }
  0x88   :  { %vm720_vm10 = vcmp.gt.s32.totalorder %v1445_v40, 4  ;;  %vm827_vm11 = vcmp.gt.s32.totalorder %v1445_v40, 5  ;;  %vm934_vm12 = vcmp.gt.s32.totalorder %v1445_v40, 6  ;;  %vm1041_vm13 = vcmp.gt.s32.totalorder %v1445_v40, 7 }
  0xdb   :  { %v1132_v18 = vpop.f32.mrb[0].mxu0 }
  0xdc   :  { %v128_v19 = vpop.f32.mrb[1].mxu0  ;;  %v134_v45 = vadd.f32 %v1132_v18, %v1431_v17 }
  0xdd   :  { %v129_v20 = vadd.f32 %v1431_v17, %v128_v19 }
  0xdf   :  { %v261_v23 = vpop.f32.mrb[0].mxu1  ;;  %v1135_v11 = vpop.f32.mrb[2].mxu0 }
  0xe0   :  { %v265_v24 = vadd.f32 %v261_v23, %v129_v20  ;;  %v1152_v25 = vpop.f32.mrb[1].mxu1  ;;  %v138_v13 = vpop.f32.mrb[3].mxu0 }
  0xe1   :  { %v139_v20 = vadd.f32 %v1431_v17, %v138_v13 }
  0xe2   :  { %v266_v26 = vmul.f32 %v265_v24, %v1434_v22 }
  0xe3   :  { %v1497_v14 = vpop.f32.mrb[4].mxu0 }
  0xe4   :  { %v1061_v27 = vmul.f32 -1.442695, %v266_v26  ;;  %v1499_v15 = vpop.f32.mrb[5].mxu0 }
  0xe5   :  { %v149_v5 = vadd.f32 %v1431_v17, %v1499_v15 }
  0xe6   :  { %1291 = vpow2.f32 %v1061_v27 }
  0xe7   :  { %v1501_v16 = vpop.f32.mrb[6].mxu0 }
  0xe8   :  { %v1503_v18 = vpop.f32.mrb[7].mxu0 }
  0xf0   :  { %v1292_v28 = vpop.eup %1291 }
  0xf1   :  { %v270_v29 = vadd.f32 1.0, %v1292_v28 }
  0xf3   :  { %1293 = vrcp.f32 %v270_v29 }
  0xfd   :  { %v1294_v30 = vpop.eup %1293 }
  0xfe   :  { %v273_v32 = vmul.f32 %v1294_v30, %v1434_v22 }
 0x100   :  { %v274_v33 = vadd.f32 %v273_v32, %v1438_v31 }
 0x102   :  { %277 = vrot.lane.b32.xlu0 %v274_v33, %s1344_s1  ;;  %v275_v36 = vmul.f32 0.0, %v274_v33 }
 0x174   :  { %v278_v34 = vpop.permute.xlu0 %277 }
 0x175   :  { %v280_v35 = vmul.f32 %v278_v34, %v274_v33 }
 0x177   :  { %282 = vrot.lane.b32.xlu0 %v280_v35, %s1345_s4 }
 0x1e9   :  { %v283_v37 = vpop.permute.xlu0 %282 }
 0x1ea   :  { %v285_v38 = vadd.f32 %v283_v37, %v275_v36 }
 0x1ec   :  { %1295 = vtanh.f32 %v285_v38  ;;  %v294_v58 = vsel %vm292_vm5, %v285_v38, 0.0 }
 0x1f6   :  { %v1296_v39 = vpop.eup %1295 }
 0x1f7   :  { %288 = vrot.lane.b32.xlu1 %v1296_v39, %s1344_s1 }
 0x269   :  { %v289_v41 = vpop.permute.xlu1 %288 }
 0x26a   :  { %v291_v42 = vmul.f32 %v289_v41, %v274_v33 }
 0x26c   :  { %v293_v43 = vsel %vm292_vm5, %v291_v42, 0.0 }
 0x26d   :  { %298 = vrot.lane.b32.xlu0 %v293_v43, %s1345_s4 }
 0x2df   :  { %v299_v44 = vpop.permute.xlu0 %298 }
 0x2e0   :  { %1162 = vmatmul.mubr.msk.f32.vlgmr.msra.gmra.mrb[2].mxu1 %vm191_vm6, %v299_v44 }
 0x2e1   :  { %1254 = vmatpush3.bf16.msra.mxu1 %v1394_v8  ;;  %1183 = vmatprep.mubr.msk.f32.mxu1 %vm1340_vm1, %v1341_v4 }
 0x2e2   :  { %1255 = vmatprep.subr.bf16.mxu1 %v1339_v0 }
 0x2e5   :  { %1257 = vmatpush3.bf16.msra.mxu1 %v1407_v12 }
 0x2e6   :  { %1264 = vmatprep.subr.bf16.mxu1 %v1339_v0 }
 0x3b3   :  { %v368_v46 = vpop.f32.mrb[2].mxu1 }
 0x3b4   :  { %v372_v47 = vadd.f32 %v368_v46, %v134_v45  ;;  %v1163_v48 = vpop.f32.mrb[3].mxu1  ;;  %v144_v45 = vadd.f32 %v1135_v11, %v1431_v17 }
 0x3b6   :  { %v373_v49 = vmul.f32 %v372_v47, %v1434_v22 }
 0x3b8   :  { %v1063_v50 = vmul.f32 -1.442695, %v373_v49 }
 0x3ba   :  { %1297 = vpow2.f32 %v1063_v50 }
 0x3c4   :  { %v1298_v51 = vpop.eup %1297 }
 0x3c5   :  { %v377_v52 = vadd.f32 1.0, %v1298_v51 }
 0x3c7   :  { %1299 = vrcp.f32 %v377_v52 }
 0x3d1   :  { %v1300_v53 = vpop.eup %1299 }
 0x3d2   :  { %v380_v54 = vmul.f32 %v1300_v53, %v1434_v22 }
 0x3d4   :  { %v381_v55 = vadd.f32 %v380_v54, %v1438_v31 }
 0x3d6   :  { %384 = vrot.lane.b32.xlu1 %v381_v55, %s1344_s1  ;;  %v382_v59 = vmul.f32 %v381_v55, %v294_v58 }
 0x448   :  { %v385_v56 = vpop.permute.xlu1 %384 }
 0x449   :  { %v387_v57 = vmul.f32 %v385_v56, %v381_v55 }
 0x44b   :  { %389 = vrot.lane.b32.xlu0 %v387_v57, %s1345_s4 }
 0x4bd   :  { %v390_v60 = vpop.permute.xlu0 %389 }
 0x4be   :  { %v392_v61 = vadd.f32 %v390_v60, %v382_v59 }
 0x4c0   :  { %1301 = vtanh.f32 %v392_v61  ;;  %v401_v35 = vsel %vm399_vm7, %v392_v61, %v294_v58 }
 0x4ca   :  { %v1302_v6 = vpop.eup %1301 }
 0x4cb   :  { %395 = vrot.lane.b32.xlu1 %v1302_v6, %s1344_s1 }
 0x53d   :  { %v396_v7 = vpop.permute.xlu1 %395 }
 0x53e   :  { %v398_v9 = vmul.f32 %v396_v7, %v381_v55 }
 0x540   :  { %v400_v10 = vsel %vm399_vm7, %v398_v9, %v293_v43 }
 0x541   :  { %405 = vrot.lane.b32.xlu0 %v400_v10, %s1345_s4 }
 0x5b3   :  { %v406_v19 = vpop.permute.xlu0 %405 }
 0x5b4   :  { %1173 = vmatmul.mubr.msk.f32.vlgmr.msra.gmra.mrb[8].mxu0 %vm191_vm6, %v406_v19 }
 0x5b5   :  { %1260 = vmatpush3.bf16.msra.mxu0 %v1394_v8  ;;  %1194 = vmatprep.mubr.msk.f32.mxu0 %vm1340_vm1, %v1341_v4 }
 0x5b6   :  { %1261 = vmatprep.subr.bf16.mxu0 %v1339_v0 }
 0x5b9   :  { %1263 = vmatpush3.bf16.msra.mxu0 %v1407_v12 }
 0x5ba   :  { %1270 = vmatprep.subr.bf16.mxu0 %v1339_v0 }
 0x687   :  { %v475_v21 = vpop.f32.mrb[8].mxu0 }
 0x688   :  { %v479_v23 = vadd.f32 %v475_v21, %v139_v20  ;;  %v1174_v24 = vpop.f32.mrb[9].mxu0 }
 0x68a   :  { %v480_v25 = vmul.f32 %v479_v23, %v1434_v22 }
 0x68c   :  { %v1065_v26 = vmul.f32 -1.442695, %v480_v25 }
 0x68e   :  { %1303 = vpow2.f32 %v1065_v26 }
 0x698   :  { %v1304_v27 = vpop.eup %1303 }
 0x699   :  { %v484_v28 = vadd.f32 1.0, %v1304_v27 }
 0x69b   :  { %1305 = vrcp.f32 %v484_v28 }
 0x6a5   :  { %v1306_v29 = vpop.eup %1305 }
 0x6a6   :  { %v487_v30 = vmul.f32 %v1306_v29, %v1434_v22 }
 0x6a8   :  { %v488_v32 = vadd.f32 %v487_v30, %v1438_v31 }
 0x6aa   :  { %491 = vrot.lane.b32.xlu1 %v488_v32, %s1344_s1  ;;  %v489_v36 = vmul.f32 %v488_v32, %v401_v35 }
 0x71c   :  { %v492_v33 = vpop.permute.xlu1 %491 }
 0x71d   :  { %v494_v34 = vmul.f32 %v492_v33, %v488_v32 }
 0x71f   :  { %496 = vrot.lane.b32.xlu0 %v494_v34, %s1345_s4 }
 0x791   :  { %v497_v37 = vpop.permute.xlu0 %496 }
 0x792   :  { %v499_v38 = vadd.f32 %v497_v37, %v489_v36 }
 0x794   :  { %1307 = vtanh.f32 %v499_v38  ;;  %v508_v58 = vsel %vm506_vm8, %v499_v38, %v401_v35  ;;  %v154_v35 = vadd.f32 %v1497_v14, %v1431_v17 }
 0x79e   :  { %v1308_v39 = vpop.eup %1307 }
 0x79f   :  { %502 = vrot.lane.b32.xlu1 %v1308_v39, %s1344_s1 }
 0x811   :  { %v503_v41 = vpop.permute.xlu1 %502 }
 0x812   :  { %v505_v42 = vmul.f32 %v503_v41, %v488_v32 }
 0x814   :  { %v507_v43 = vsel %vm506_vm8, %v505_v42, %v400_v10 }
 0x815   :  { %512 = vrot.lane.b32.xlu0 %v507_v43, %s1345_s4 }
 0x887   :  { %v513_v44 = vpop.permute.xlu0 %512 }
 0x888   :  { %1184 = vmatmul.mubr.msk.f32.vlgmr.msra.gmra.mrb[4].mxu1 %vm191_vm6, %v513_v44 }
 0x889   :  { %1266 = vmatpush3.bf16.msra.mxu1 %v1394_v8  ;;  %1205 = vmatprep.mubr.msk.f32.mxu1 %vm1340_vm1, %v1341_v4 }
 0x88a   :  { %1267 = vmatprep.subr.bf16.mxu1 %v1339_v0 }
 0x88d   :  { %1269 = vmatpush3.bf16.msra.mxu1 %v1407_v12 }
 0x88e   :  { %1276 = vmatprep.subr.bf16.mxu1 %v1339_v0 }
 0x95b   :  { %v582_v46 = vpop.f32.mrb[4].mxu1 }
 0x95c   :  { %v586_v47 = vadd.f32 %v582_v46, %v144_v45  ;;  %v1185_v48 = vpop.f32.mrb[5].mxu1 }
 0x95e   :  { %v587_v49 = vmul.f32 %v586_v47, %v1434_v22 }
 0x960   :  { %v1067_v50 = vmul.f32 -1.442695, %v587_v49 }
 0x962   :  { %1309 = vpow2.f32 %v1067_v50 }
 0x96c   :  { %v1310_v51 = vpop.eup %1309 }
 0x96d   :  { %v591_v52 = vadd.f32 1.0, %v1310_v51 }
 0x96f   :  { %1311 = vrcp.f32 %v591_v52 }
 0x979   :  { %v1312_v53 = vpop.eup %1311 }
 0x97a   :  { %v594_v54 = vmul.f32 %v1312_v53, %v1434_v22  ;;  %v159_v53 = vadd.f32 %v1431_v17, %v1503_v18 }
 0x97c   :  { %v595_v55 = vadd.f32 %v594_v54, %v1438_v31 }
 0x97e   :  { %598 = vrot.lane.b32.xlu1 %v595_v55, %s1344_s1  ;;  %v596_v59 = vmul.f32 %v595_v55, %v508_v58 }
 0x9f0   :  { %v599_v56 = vpop.permute.xlu1 %598 }
 0x9f1   :  { %v601_v57 = vmul.f32 %v599_v56, %v595_v55 }
 0x9f3   :  { %603 = vrot.lane.b32.xlu0 %v601_v57, %s1345_s4 }
 0xa65   :  { %v604_v60 = vpop.permute.xlu0 %603 }
 0xa66   :  { %v606_v61 = vadd.f32 %v604_v60, %v596_v59 }
 0xa68   :  { %1313 = vtanh.f32 %v606_v61  ;;  %v615_v15 = vsel %vm613_vm9, %v606_v61, %v508_v58 }
 0xa72   :  { %v1314_v62 = vpop.eup %1313 }
 0xa73   :  { %609 = vrot.lane.b32.xlu1 %v1314_v62, %s1344_s1 }
 0xae5   :  { %v610_v63 = vpop.permute.xlu1 %609 }
 0xae6   :  { %v612_v1 = vmul.f32 %v610_v63, %v595_v55 }
 0xae8   :  { %v614_v2 = vsel %vm613_vm9, %v612_v1, %v507_v43 }
 0xae9   :  { %619 = vrot.lane.b32.xlu0 %v614_v2, %s1345_s4 }
 0xb5b   :  { %v620_v3 = vpop.permute.xlu0 %619 }
 0xb5c   :  { %1195 = vmatmul.mubr.msk.f32.vlgmr.msra.gmra.mrb[10].mxu0 %vm191_vm6, %v620_v3 }
 0xb5d   :  { %1272 = vmatpush3.bf16.msra.mxu0 %v1394_v8  ;;  %1216 = vmatprep.mubr.msk.f32.mxu0 %vm1340_vm1, %v1341_v4 }
 0xb5e   :  { %1273 = vmatprep.subr.bf16.mxu0 %v1339_v0 }
 0xb61   :  { %1275 = vmatpush3.bf16.msra.mxu0 %v1407_v12 }
 0xc2f   :  { %v689_v6 = vpop.f32.mrb[10].mxu0 }
 0xc30   :  { %v693_v7 = vadd.f32 %v689_v6, %v149_v5  ;;  %v1196_v9 = vpop.f32.mrb[11].mxu0 }
 0xc32   :  { %v694_v10 = vmul.f32 %v693_v7, %v1434_v22 }
 0xc34   :  { %v1069_v11 = vmul.f32 -1.442695, %v694_v10 }
 0xc36   :  { %1315 = vpow2.f32 %v1069_v11 }
 0xc40   :  { %v1316_v13 = vpop.eup %1315 }
 0xc41   :  { %v698_v19 = vadd.f32 1.0, %v1316_v13 }
 0xc43   :  { %1317 = vrcp.f32 %v698_v19  ;;  %v164_v19 = vadd.f32 %v1501_v16, %v1431_v17 }
 0xc4d   :  { %v1318_v20 = vpop.eup %1317 }
 0xc4e   :  { %v701_v21 = vmul.f32 %v1318_v20, %v1434_v22 }
 0xc50   :  { %v702_v23 = vadd.f32 %v701_v21, %v1438_v31 }
 0xc52   :  { %705 = vrot.lane.b32.xlu1 %v702_v23, %s1344_s1  ;;  %v703_v26 = vmul.f32 %v702_v23, %v615_v15 }
 0xcc4   :  { %v706_v24 = vpop.permute.xlu1 %705 }
 0xcc5   :  { %v708_v25 = vmul.f32 %v706_v24, %v702_v23 }
 0xcc7   :  { %710 = vrot.lane.b32.xlu0 %v708_v25, %s1345_s4 }
 0xd39   :  { %v711_v27 = vpop.permute.xlu0 %710 }
 0xd3a   :  { %v713_v28 = vadd.f32 %v711_v27, %v703_v26 }
 0xd3c   :  { %1319 = vtanh.f32 %v713_v28  ;;  %v722_v14 = vsel %vm720_vm10, %v713_v28, %v615_v15 }
 0xd46   :  { %v1320_v29 = vpop.eup %1319 }
 0xd47   :  { %716 = vrot.lane.b32.xlu1 %v1320_v29, %s1344_s1 }
 0xdb9   :  { %v717_v30 = vpop.permute.xlu1 %716 }
 0xdba   :  { %v719_v32 = vmul.f32 %v717_v30, %v702_v23 }
 0xdbc   :  { %v721_v33 = vsel %vm720_vm10, %v719_v32, %v614_v2 }
 0xdbd   :  { %726 = vrot.lane.b32.xlu0 %v721_v33, %s1345_s4 }
 0xe2f   :  { %v727_v34 = vpop.permute.xlu0 %726 }
 0xe30   :  { %1206 = vmatmul.mubr.msk.f32.vlgmr.msra.gmra.mrb[6].mxu1 %vm191_vm6, %v727_v34 }
 0xe31   :  { %1278 = vmatpush3.bf16.msra.mxu1 %v1394_v8  ;;  %1227 = vmatprep.mubr.msk.f32.mxu1 %vm1340_vm1, %v1341_v4 }
 0xe32   :  { %1279 = vmatprep.subr.bf16.mxu1 %v1339_v0 }
 0xe35   :  { %1281 = vmatpush3.bf16.msra.mxu1 %v1407_v12 }
 0xf03   :  { %v796_v36 = vpop.f32.mrb[6].mxu1 }
 0xf04   :  { %v800_v37 = vadd.f32 %v796_v36, %v154_v35  ;;  %v1207_v38 = vpop.f32.mrb[7].mxu1 }
 0xf06   :  { %v801_v39 = vmul.f32 %v800_v37, %v1434_v22 }
 0xf08   :  { %v1071_v41 = vmul.f32 -1.442695, %v801_v39 }
 0xf0a   :  { %1321 = vpow2.f32 %v1071_v41 }
 0xf14   :  { %v1322_v42 = vpop.eup %1321 }
 0xf15   :  { %v805_v43 = vadd.f32 1.0, %v1322_v42 }
 0xf17   :  { %1323 = vrcp.f32 %v805_v43 }
 0xf21   :  { %v1324_v8 = vpop.eup %1323 }
 0xf22   :  { %v808_v4 = vmul.f32 %v1324_v8, %v1434_v22 }
 0xf24   :  { %v809_v0 = vadd.f32 %v808_v4, %v1438_v31 }
 0xf26   :  { %812 = vrot.lane.b32.xlu1 %v809_v0, %s1344_s1  ;;  %v810_v45 = vmul.f32 %v809_v0, %v722_v14 }
 0xf98   :  { %v813_v12 = vpop.permute.xlu1 %812 }
 0xf99   :  { %v815_v44 = vmul.f32 %v813_v12, %v809_v0 }
 0xf9b   :  { %817 = vrot.lane.b32.xlu0 %v815_v44, %s1345_s4 }
0x100d   :  { %v818_v46 = vpop.permute.xlu0 %817 }
0x100e   :  { %v820_v47 = vadd.f32 %v818_v46, %v810_v45 }
0x1010   :  { %1325 = vtanh.f32 %v820_v47  ;;  %v829_v18 = vsel %vm827_vm11, %v820_v47, %v722_v14 }
0x101a   :  { %v1326_v48 = vpop.eup %1325 }
0x101b   :  { %823 = vrot.lane.b32.xlu1 %v1326_v48, %s1344_s1 }
0x108d   :  { %v824_v49 = vpop.permute.xlu1 %823 }
0x108e   :  { %v826_v50 = vmul.f32 %v824_v49, %v809_v0 }
0x1090   :  { %v828_v51 = vsel %vm827_vm11, %v826_v50, %v721_v33 }
0x1091   :  { %833 = vrot.lane.b32.xlu0 %v828_v51, %s1345_s4 }
0x1103   :  { %v834_v52 = vpop.permute.xlu0 %833 }
0x1104   :  { %1217 = vmatmul.mubr.msk.f32.vlgmr.msra.gmra.mrb[12].mxu0 %vm191_vm6, %v834_v52 }
0x11d7   :  { %v903_v54 = vpop.f32.mrb[12].mxu0 }
0x11d8   :  { %v907_v55 = vadd.f32 %v903_v54, %v159_v53  ;;  %v1218_v56 = vpop.f32.mrb[13].mxu0 }
0x11da   :  { %v908_v57 = vmul.f32 %v907_v55, %v1434_v22 }
0x11dc   :  { %v1073_v58 = vmul.f32 -1.442695, %v908_v57 }
0x11de   :  { %1327 = vpow2.f32 %v1073_v58 }
0x11e8   :  { %v1328_v59 = vpop.eup %1327 }
0x11e9   :  { %v912_v60 = vadd.f32 1.0, %v1328_v59 }
0x11eb   :  { %1329 = vrcp.f32 %v912_v60 }
0x11f5   :  { %v1330_v61 = vpop.eup %1329 }
0x11f6   :  { %v915_v62 = vmul.f32 %v1330_v61, %v1434_v22 }
0x11f8   :  { %v916_v63 = vadd.f32 %v915_v62, %v1438_v31 }
0x11fa   :  { %919 = vrot.lane.b32.xlu1 %v916_v63, %s1344_s1  ;;  %v917_v3 = vmul.f32 %v916_v63, %v829_v18 }
0x126c   :  { %v920_v1 = vpop.permute.xlu1 %919 }
0x126d   :  { %v922_v2 = vmul.f32 %v920_v1, %v916_v63 }
0x126f   :  { %924 = vrot.lane.b32.xlu0 %v922_v2, %s1345_s4 }
0x12e1   :  { %v925_v5 = vpop.permute.xlu0 %924 }
0x12e2   :  { %v927_v6 = vadd.f32 %v925_v5, %v917_v3 }
0x12e4   :  { %1331 = vtanh.f32 %v927_v6  ;;  %v936_v17 = vsel %vm934_vm12, %v927_v6, %v829_v18 }
0x12ee   :  { %v1332_v7 = vpop.eup %1331 }
0x12ef   :  { %930 = vrot.lane.b32.xlu1 %v1332_v7, %s1344_s1 }
0x1361   :  { %v931_v9 = vpop.permute.xlu1 %930 }
0x1362   :  { %v933_v10 = vmul.f32 %v931_v9, %v916_v63 }
0x1364   :  { %v935_v11 = vsel %vm934_vm12, %v933_v10, %v828_v51 }
0x1365   :  { %940 = vrot.lane.b32.xlu0 %v935_v11, %s1345_s4 }
0x13d7   :  { %v941_v13 = vpop.permute.xlu0 %940 }
0x13d8   :  { %1228 = vmatmul.mubr.msk.f32.vlgmr.msra.gmra.mrb[8].mxu1 %vm191_vm6, %v941_v13 }
0x14ab   :  { %v1010_v20 = vpop.f32.mrb[8].mxu1 }
0x14ac   :  { %v1014_v21 = vadd.f32 %v1010_v20, %v164_v19  ;;  %v1229_v23 = vpop.f32.mrb[9].mxu1 }
0x14ae   :  { %v1015_v24 = vmul.f32 %v1014_v21, %v1434_v22 }
0x14b0   :  { %v1075_v25 = vmul.f32 -1.442695, %v1015_v24 }
0x14b2   :  { %1333 = vpow2.f32 %v1075_v25 }
0x14bc   :  { %v1334_v15 = vpop.eup %1333 }
0x14bd   :  { %v1019_v26 = vadd.f32 1.0, %v1334_v15 }
0x14bf   :  { %1335 = vrcp.f32 %v1019_v26 }
0x14c9   :  { %v1336_v27 = vpop.eup %1335 }
0x14ca   :  { %v1022_v28 = vmul.f32 %v1336_v27, %v1434_v22 }
0x14cc   :  { %v1023_v29 = vadd.f32 %v1022_v28, %v1438_v31 }
0x14ce   :  { %1026 = vrot.lane.b32.xlu1 %v1023_v29, %s1344_s1  ;;  %v1024_v16 = vmul.f32 %v1023_v29, %v936_v17 }
0x1540   :  { %v1027_v30 = vpop.permute.xlu1 %1026 }
0x1541   :  { %v1029_v32 = vmul.f32 %v1027_v30, %v1023_v29 }
0x1543   :  { %1031 = vrot.lane.b32.xlu0 %v1029_v32, %s1345_s4 }
0x15b5   :  { %v1032_v33 = vpop.permute.xlu0 %1031 }
0x15b6   :  { %v1034_v34 = vadd.f32 %v1032_v33, %v1024_v16 }
0x15b8   :  { %1337 = vtanh.f32 %v1034_v34 }
0x15c2   :  { %v1338_v35 = vpop.eup %1337 }
0x15c3   :  { %1037 = vrot.lane.b32.xlu1 %v1338_v35, %s1344_s1 }
0x1635   :  { %v1038_v36 = vpop.permute.xlu1 %1037 }
0x1636   :  { %v1040_v22 = vmul.f32 %v1038_v36, %v1023_v29 }
0x1638   :  { %v1042_v31 = vsel %vm1041_vm13, %v1040_v22, %v935_v11 }
0x1639   :  { %1044 = vrot.lane.b32.xlu0 %v1042_v31, %s1345_s4 }
0x16ab   :  { %v1045_v37 = vpop.permute.xlu0 %1044 }
0x16ac   :  { %1047 = vst.msk [vmem:[%s1622_s5] sm:$0xff] %vm191_vm6, %v1045_v37 }

</bundles_post_ra>
